<compile_context>
chip_gen: v6e
topology: v6e:2x2x1
jax: 0.10.0
libtpu: 0.0.40
codegen_flags: <defaults>
</compile_context>

<pallas_src>
import math

import jax
import jax.numpy as jnp
from jax.experimental import pallas as pl
from jax.experimental.pallas import tpu as pltpu


def lstm_cell_kernel(xh_ref, c_ref, w_ref, hc_out_ref):
    """One fused LSTM-cell step.

    xh_ref : (B_pad, Din + H)  concatenated [x | h_prev]
    c_ref  : (B_pad, H)        previous cell state
    w_ref  : (Din + H, 4H)     fused gate weights, columns ordered [i|f|g|o]
    hc_out : (B_pad, 2H)       output slab [h_new | c_new]
    """
    xh = xh_ref[...]
    c = c_ref[...]
    H = c.shape[1]

    # Single MXU matmul producing all four gates, lane-dense N = 4H.
    z = jnp.dot(xh, w_ref[...], preferred_element_type=jnp.float32)

    i = jax.nn.sigmoid(z[:, 0 * H:1 * H])
    f = jax.nn.sigmoid(z[:, 1 * H:2 * H])
    g = jnp.tanh(z[:, 2 * H:3 * H])
    o = jax.nn.sigmoid(z[:, 3 * H:4 * H])

    c_new = f * c + i * g
    # Faithful to the reference module: h = o * tanh(c_prev), NOT tanh(c_new).
    h_new = o * jnp.tanh(c)

    # One wide store of [h | c] instead of two narrow masked stores.
    hc_out_ref[...] = jnp.concatenate([h_new, c_new], axis=1).astype(hc_out_ref.dtype)


def _round_up(n, m):
    return ((n + m - 1) // m) * m


def lstm_cell(x, h_prev, c_prev, params):
    """One LSTM-cell step.  Uses the fused weight params['W_fused']."""
    B, Din = x.shape
    H = c_prev.shape[1]
    W = params["W_fused"]                      # (Din + H, 4H), f32
    assert W.shape == (Din + H, 4 * H)

    # Pad batch to a multiple of 8 sublanes so vregs/MXU rows aren't mostly masked.
    B_pad = max(8, _round_up(B, 8))

    xh = jnp.concatenate([x, h_prev], axis=1)  # (B, Din + H)
    if B_pad != B:
        pad = ((0, B_pad - B), (0, 0))
        xh = jnp.pad(xh, pad)
        c_in = jnp.pad(c_prev, pad)
    else:
        c_in = c_prev

    vmem = pl.BlockSpec(memory_space=pltpu.MemorySpace.VMEM)

    hc = pl.pallas_call(
        lstm_cell_kernel,
        out_shape=jax.ShapeDtypeStruct((B_pad, 2 * H), jnp.float32),
        in_specs=[vmem, vmem, vmem],
        out_specs=vmem,
    )(xh, c_in, W)

    h_new = hc[:B, :H]
    c_new = hc[:B, H:]
    return h_new, c_new


def init_lstm_params(key, in_features, out_features):
    """Init matching the PyTorch module's uniform(-sqrt(1/out), sqrt(1/out)).

    Stores both the per-gate transposed weights (for the pure-JAX reference)
    and the fused (in+H, 4H) weight used by the Pallas kernel.
    """
    bound = math.sqrt(1.0 / out_features)
    names = ["Wi", "Ui", "Wf", "Uf", "Wg", "Ug", "Wo", "Uo"]
    shapes = {
        "Wi": (out_features, in_features), "Ui": (out_features, out_features),
        "Wf": (out_features, in_features), "Uf": (out_features, out_features),
        "Wg": (out_features, in_features), "Ug": (out_features, out_features),
        "Wo": (out_features, in_features), "Uo": (out_features, out_features),
    }
    keys = jax.random.split(key, len(names))
    params = {}
    for name, kk in zip(names, keys):
        w = jax.random.uniform(kk, shapes[name], dtype=jnp.float32,
                               minval=-bound, maxval=bound)
        params[name + "_t"] = w.T  # so x @ W.T == x @ W_t

    # Fused layout: rows = [x-part ; h-part], cols = [i | f | g | o].
    wx = jnp.concatenate(
        [params["Wi_t"], params["Wf_t"], params["Wg_t"], params["Wo_t"]], axis=1)
    wh = jnp.concatenate(
        [params["Ui_t"], params["Uf_t"], params["Ug_t"], params["Uo_t"]], axis=1)
    params["W_fused"] = jnp.concatenate([wx, wh], axis=0)  # (in+H, 4H)
    return params


def lstm_ref(x, h_prev, c_prev, params):
    """Pure-JAX reference mirroring the PyTorch forward exactly."""
    i = jax.nn.sigmoid(x @ params["Wi_t"] + h_prev @ params["Ui_t"])
    f = jax.nn.sigmoid(x @ params["Wf_t"] + h_prev @ params["Uf_t"])
    g = jnp.tanh(x @ params["Wg_t"] + h_prev @ params["Ug_t"])
    o = jax.nn.sigmoid(x @ params["Wo_t"] + h_prev @ params["Uo_t"])
    c = f * c_prev + i * g
    h = o * jnp.tanh(c_prev)
    return h, c


if __name__ == "__main__":
    B = 2
    IN_FEATURES = 16
    OUT_FEATURES = 32   # 4H = 128 -> one lane-dense matmul output

    root = jax.random.PRNGKey(0)
    k_param, k_x, k_h, k_c = jax.random.split(root, 4)

    params = init_lstm_params(k_param, IN_FEATURES, OUT_FEATURES)
    x = jax.random.normal(k_x, (B, IN_FEATURES), dtype=jnp.float32)

    # state=None in the module -> zeros initial state
    h_prev = jnp.zeros((B, OUT_FEATURES), dtype=jnp.float32)
    c_prev = jnp.zeros((B, OUT_FEATURES), dtype=jnp.float32)

    h_new, c_new = lstm_cell(x, h_prev, c_prev, params)
    jax.block_until_ready((h_new, c_new))

    # Also exercise a nonzero state and check against the pure-JAX reference.
    h_prev2 = jax.random.normal(k_h, (B, OUT_FEATURES), dtype=jnp.float32)
    c_prev2 = jax.random.normal(k_c, (B, OUT_FEATURES), dtype=jnp.float32)
    h2, c2 = lstm_cell(x, h_prev2, c_prev2, params)
    jax.block_until_ready((h2, c2))

    h_ref, c_ref = lstm_ref(x, h_prev2, c_prev2, params)
    assert jnp.allclose(h2, h_ref, atol=1e-5, rtol=1e-5)
    assert jnp.allclose(c2, c_ref, atol=1e-5, rtol=1e-5)

    h_ref0, c_ref0 = lstm_ref(x, h_prev, c_prev, params)
    assert jnp.allclose(h_new, h_ref0, atol=1e-5, rtol=1e-5)
    assert jnp.allclose(c_new, c_ref0, atol=1e-5, rtol=1e-5)

    # TODO(synk): if this cell is ever driven over a time sequence, move the
    # step loop inside the kernel (grid over T, weights resident in VMEM,
    # h/c carried in scratch) instead of one pallas_call per step.
    print("KERNEL_OK")
</pallas_src>

<mosaic_0001>
module attributes {stable_mosaic.version = 11 : i64} {
  func.func @lstm_cell_kernel(%arg0: memref<8x48xf32, #tpu.memory_space<vmem>>, %arg1: memref<8x32xf32, #tpu.memory_space<vmem>>, %arg2: memref<48x128xf32, #tpu.memory_space<vmem>>, %arg3: memref<8x64xf32, #tpu.memory_space<vmem>>) attributes {dimension_semantics = [], scalar_prefetch = 0 : i64, scratch_operands = 0 : i64, tpu.core_type = #tpu.core_type<tc>} {
    %c0 = arith.constant 0 : index
    %c0_0 = arith.constant 0 : index
    %0 = vector.load %arg0[%c0, %c0_0] : memref<8x48xf32, #tpu.memory_space<vmem>>, vector<8x48xf32>
    %c0_1 = arith.constant 0 : index
    %c0_2 = arith.constant 0 : index
    %1 = vector.load %arg1[%c0_1, %c0_2] : memref<8x32xf32, #tpu.memory_space<vmem>>, vector<8x32xf32>
    %c0_3 = arith.constant 0 : index
    %c0_4 = arith.constant 0 : index
    %2 = vector.load %arg2[%c0_3, %c0_4] : memref<48x128xf32, #tpu.memory_space<vmem>>, vector<48x128xf32>
    %cst = arith.constant dense<0.000000e+00> : vector<8x128xf32>
    %3 = tpu.matmul %0, %2, %cst {dimension_numbers = #tpu.dot_dimension_numbers<[1], [0], [0], [1], [0, 0, 1, 1], [], []>} : vector<8x48xf32>, vector<48x128xf32>, vector<8x128xf32> -> vector<8x128xf32>
    %4 = vector.extract_strided_slice %3 {offsets = [0, 0], sizes = [8, 32], strides = [1, 1]} : vector<8x128xf32> to vector<8x32xf32>
    %5 = arith.negf %4 : vector<8x32xf32>
    %6 = math.exp %5 : vector<8x32xf32>
    %cst_5 = arith.constant 1.000000e+00 : f32
    %7 = vector.broadcast %cst_5 : f32 to vector<8x32xf32>
    %8 = arith.addf %7, %6 : vector<8x32xf32>
    %9 = arith.divf %7, %8 : vector<8x32xf32>
    %10 = vector.extract_strided_slice %3 {offsets = [0, 32], sizes = [8, 32], strides = [1, 1]} : vector<8x128xf32> to vector<8x32xf32>
    %11 = arith.negf %10 : vector<8x32xf32>
    %12 = math.exp %11 : vector<8x32xf32>
    %cst_6 = arith.constant 1.000000e+00 : f32
    %13 = vector.broadcast %cst_6 : f32 to vector<8x32xf32>
    %14 = arith.addf %13, %12 : vector<8x32xf32>
    %15 = arith.divf %13, %14 : vector<8x32xf32>
    %16 = vector.extract_strided_slice %3 {offsets = [0, 64], sizes = [8, 32], strides = [1, 1]} : vector<8x128xf32> to vector<8x32xf32>
    %17 = math.tanh %16 : vector<8x32xf32>
    %18 = vector.extract_strided_slice %3 {offsets = [0, 96], sizes = [8, 32], strides = [1, 1]} : vector<8x128xf32> to vector<8x32xf32>
    %19 = arith.negf %18 : vector<8x32xf32>
    %20 = math.exp %19 : vector<8x32xf32>
    %cst_7 = arith.constant 1.000000e+00 : f32
    %21 = vector.broadcast %cst_7 : f32 to vector<8x32xf32>
    %22 = arith.addf %21, %20 : vector<8x32xf32>
    %23 = arith.divf %21, %22 : vector<8x32xf32>
    %24 = arith.mulf %15, %1 : vector<8x32xf32>
    %25 = arith.mulf %9, %17 : vector<8x32xf32>
    %26 = arith.addf %24, %25 : vector<8x32xf32>
    %27 = math.tanh %1 : vector<8x32xf32>
    %28 = arith.mulf %23, %27 : vector<8x32xf32>
    %29 = tpu.concatenate %28, %26 in 1 : vector<8x32xf32>, vector<8x32xf32> -> vector<8x64xf32>
    %c0_8 = arith.constant 0 : index
    %c0_9 = arith.constant 0 : index
    %30 = vector.load %arg3[%c0_8, %c0_9] : memref<8x64xf32, #tpu.memory_space<vmem>>, vector<8x64xf32>
    tpu.vector_store %arg3[%c0_8, %c0_9], %29 {strides = array<i32>} : memref<8x64xf32, #tpu.memory_space<vmem>>, vector<8x64xf32>,
    return
  }
}

</mosaic_0001>

<bundles_post_ra>
// kernel: tpu_custom_call.1
= control target key start
LH: loop header
LB: loop body
LE: loop exit
PB: predicated region body
PF: predicated region fallthrough
CT: control target
= control target key end

     0   :  { %8 = vsyncpa [#allocation3], 0  ;;  %s361_s0 = inlined_call_operand.hbm [shape: f32[8,48], index: 0, kind: input, shape index: {}]   ;;  %s362_s1 = inlined_call_operand.hbm [shape: f32[8,32], index: 1, kind: input, shape index: {}]   ;;  %s363_s2 = inlined_call_operand.hbm [shape: f32[48,128], index: 2, kind: input, shape index: {}]   ;;  %s364_s3 = inlined_call_operand.hbm [shape: f32[8,64], index: 3, kind: output, shape index: {}]  }
   0x1   :  { %9 = vsyncpa [#allocation6], 0 }
   0x2   :  { %10 = vsyncpa [#allocation4], 0  ;;  %s315_s12 = smov [#allocation5]   ;;  %s316_s14 = smov [#allocation2]  }
   0x3   :  { %s27_s13 = sshll.u32 %s315_s12, 4  ;;  %s17_s15 = sshll.u32 %s316_s14, 4  ;;  %s28_s13 = int_to_ptr.vmem [resolvable:$true] %s27_s13  ;;  %s18_s15 = int_to_ptr.vmem [resolvable:$true] %s17_s15 }
   0x4   :  { %s237_s16 = scalar_lea.vmem %s28_s13, 128  ;;  %p242_p1 = scmp.lt.s32.totalorder %s28_s13, %s28_s13 }
   0x5   :  { %p238_p0 = scmp.ne.s32.totalorder %s28_s13, %s237_s16  ;;  %p243_p2 = scmp.lt.s32.totalorder %s237_s16, %s237_s16 }
   0x7   :  { %p244_p3 = por %p243_p2, %p242_p1 }
   0x9   :  { %p245_p4 = pnand %p244_p3, %p238_p0 }
   0xb   :  { %248 = shalt.err (!%p245_p4)
}
   0xc   :  { %30 = dma.hbm_to_vmem [thread:$0]  %s362_s1, 128, %s28_s13, [#allocation6]  }
   0xd   :  { %s257_s19 = scalar_lea.vmem %s18_s15, 128  ;;  %p262_p6 = scmp.lt.s32.totalorder %s18_s15, %s18_s15 }
   0xe   :  { %p258_p5 = scmp.ne.s32.totalorder %s18_s15, %s257_s19  ;;  %p263_p7 = scmp.lt.s32.totalorder %s257_s19, %s257_s19 }
  0x10   :  { %p264_p8 = por %p263_p7, %p262_p6 }
  0x12   :  { %p265_p9 = pnand %p264_p8, %p258_p5 }
  0x14   :  { %268 = shalt.err (!%p265_p9)
}
  0x15   :  { %20 = dma.hbm_to_vmem [thread:$0]  %s361_s0, 128, %s18_s15, [#allocation3]  }
  0x16   :  { %s317_s22 = smov [#allocation7]  }
  0x17   :  { %s36_s23 = sshll.u32 %s317_s22, 4  ;;  %s37_s23 = int_to_ptr.vmem [resolvable:$true] %s36_s23 }
  0x18   :  { %s277_s24 = scalar_lea.vmem %s37_s23, 768  ;;  %p282_p11 = scmp.lt.s32.totalorder %s37_s23, %s37_s23 }
  0x19   :  { %p278_p10 = scmp.ne.s32.totalorder %s37_s23, %s277_s24  ;;  %p283_p12 = scmp.lt.s32.totalorder %s277_s24, %s277_s24 }
  0x1b   :  { %p284_p13 = por %p283_p12, %p282_p11 }
  0x1d   :  { %p285_p0 = pnand %p284_p13, %p278_p10 }
  0x1f   :  { %288 = shalt.err (!%p285_p0)
}
  0x20   :  { %s318_s1 = smov 128   ;;  %s319_s25 = smov 8  }
  0x21   :  { %42 = dma.hbm_to_vmem [thread:$0]  %s363_s2, 768, %s37_s23, [#allocation6], %s318_s1, %s318_s1, %s319_s25  }
  0x22   :  { %309 = dma.done.wait [#allocation3], 128  }
  0x23   :  { %310 = vsyncadd [#allocation3], 4294967168 }
  0x24   :  { %311 = dma.done.wait [#allocation6], 896  }
  0x25   :  { %312 = vsyncadd [#allocation6], 4294966400  ;;  %v320_v0 = vmov 0.0   ;;  %vm321_vm0 = vmmov 0   ;;  %v59_v1 = vld [vmem:[#allocation7 + $0x28] sm:$0xff]  ;;  %v58_v2 = vld [vmem:[#allocation7 + $0x20] sm:$0xff] }
  0x26   :  { %195 = vmatprep.subr.mxu0 %v320_v0  ;;  %207 = vmatprep.mubr.msk.f32.mxu0 %vm321_vm0, %v320_v0  ;;  %v57_v3 = vld [vmem:[#allocation7 + $0x18] sm:$0xff]  ;;  %s322_s0 = smov 32   ;;  %v56_v5 = vld [vmem:[#allocation7 + $0x10] sm:$0xff]  ;;  %v55_v6 = vld [vmem:[#allocation7 + $0x8] sm:$0xff]  ;;  %vm60_vm1 = vcmask 392192   ;;  %s323_s2 = smov 64  }
  0x27   :  { %196 = vmatpush3.msra.mxu0 %v59_v1  ;;  %v53_v4 = vld [vmem:[#allocation5] sm:$0xff]  ;;  %v54_v7 = vld [vmem:[#allocation7] sm:$0xff]  ;;  %v52_v8 = vld [vmem:[#allocation2] sm:$0xff]  ;;  %s324_s28 = smov 96   ;;  %s325_s29 = smov [#allocation8]   ;;  %vm166_vm2 = vcmask 261120  }
  0x28   :  { %197 = vmatprep.subr.mxu0 %v320_v0  ;;  %142 = vrot.lane.b32.xlu1 %v53_v4, %s322_s0  ;;  %s176_s30 = sshll.u32 %s325_s29, 4  ;;  %vm168_vm3 = vcmask 523264   ;;  %s177_s30 = int_to_ptr.vmem [resolvable:$true] %s176_s30 }
  0x29   :  { %198 = vmatpush3.msra.mxu0 %v58_v2  ;;  %s289_s4 = scalar_lea.vmem %s177_s30, 128  ;;  %p294_p2 = scmp.lt.s32.totalorder %s177_s30, %s177_s30 }
  0x2a   :  { %199 = vmatprep.subr.mxu0 %v320_v0  ;;  %p290_p1 = scmp.ne.s32.totalorder %s177_s30, %s289_s4  ;;  %p295_p3 = scmp.lt.s32.totalorder %s289_s4, %s289_s4 }
  0x2b   :  { %200 = vmatpush3.msra.mxu0 %v57_v3 }
  0x2c   :  { %201 = vmatprep.subr.mxu0 %v320_v0  ;;  %p296_p4 = por %p295_p3, %p294_p2 }
  0x2d   :  { %202 = vmatpush3.msra.mxu0 %v56_v5 }
  0x2e   :  { %203 = vmatprep.subr.mxu0 %v320_v0  ;;  %p297_p5 = pnand %p296_p4, %p290_p1 }
  0x2f   :  { %204 = vmatpush3.msra.mxu0 %v55_v6 }
  0x30   :  { %205 = vmatprep.subr.mxu0 %v320_v0 }
  0x31   :  { %206 = vmatpush3.msra.mxu0 %v54_v7 }
  0x32   :  { %208 = vmatmul.mubr.msk.f32.vlgmr.msra.gmra.mxu0 %vm60_vm1, %v52_v8 }
  0x9a   :  { %v143_v21 = vpop.permute.xlu1 %142 }
  0xf2   :  { %v130_v9 = vpop.f32.mrf.mxu0 }
  0xf3   :  { %221 = vtanh.f32 %v130_v9  ;;  %v187_v13 = vmul.f32 -1.442695, %v130_v9 }
  0xf4   :  { %v209_v10 = vpop.f32.mrf.mxu0  ;;  %223 = vtanh.f32 %v53_v4 }
  0xf5   :  { %225 = vpow2.f32 %v187_v13 }
 0x100   :  { %v222_v11 = vpop.eup %221 }
 0x101   :  { %147 = vrot.lane.b32.xlu0 %v222_v11, %s323_s2  ;;  %v224_v12 = vpop.eup %223 }
 0x102   :  { %v226_v14 = vpop.eup %225 }
 0x103   :  { %v137_v15 = vadd.f32 1.0, %v226_v14 }
 0x105   :  { %158 = vrot.lane.b32.xlu0 %v224_v12, %s324_s28  ;;  %227 = vrcp.f32 %v137_v15 }
 0x112   :  { %v228_v16 = vpop.eup %227 }
 0x113   :  { %v145_v23 = vmul.f32 %v228_v16, %v143_v21 }
 0x173   :  { %v148_v17 = vpop.permute.xlu0 %147 }
 0x174   :  { %v150_v18 = vmul.f32 %v228_v16, %v148_v17 }
 0x176   :  { %152 = vrot.lane.b32.xlu1 %v150_v18, %s322_s0 }
 0x177   :  { %v159_v19 = vpop.permute.xlu0 %158 }
 0x178   :  { %v161_v20 = vmul.f32 %v228_v16, %v159_v19 }
 0x17a   :  { %163 = vrot.lane.b32.xlu0 %v161_v20, %s322_s0 }
 0x1e8   :  { %v153_v22 = vpop.permute.xlu1 %152 }
 0x1e9   :  { %v155_v24 = vadd.f32 %v153_v22, %v145_v23 }
 0x1ec   :  { %v164_v25 = vpop.permute.xlu0 %163 }
 0x1ed   :  { %v167_v26 = vsel %vm166_vm2, %v164_v25, %v155_v24 }
 0x1ee   :  { %169 = vst.msk [vmem:[#allocation8] sm:$0xff] %vm168_vm3, %v167_v26 }
 0x1ef   :  { %300 = shalt.err (!%p297_p5)
}
 0x1f0   :  { %179 = dma.vmem_to_hbm [thread:$0]  %s177_s30, 128, %s364_s3, [#allocation4]  }
 0x1f1   :  { %313 = dma.done.wait [#allocation4], 128  }
 0x1f2   :  { %314 = vsyncadd [#allocation4], 4294967168 }
 0x1f3   :  { %183 = vsyncpa [#allocation3], 1 }
 0x1f4   :  { %184 = vsyncpa [#allocation6], 1 }
 0x1f5   :  { %185 = vsyncpa [#allocation4], 1 }

</bundles_post_ra>
